<compile_context>
chip_gen: v7x
topology: tpu7x:2x2x1
jax: 0.10.0
libtpu: 0.0.40
codegen_flags: <defaults>
</compile_context>

<pallas_src>
import jax
import jax.numpy as jnp
from jax.experimental import pallas as pl
from jax.experimental.pallas import tpu as pltpu

Z_DIM = 32            # latent z dim
HIDDEN = 64           # mapping hidden dim (logical)
W_DIM = 32            # style w dim (logical)
HIDDEN_PAD = 128      # lane-dense padded hidden dim
W_DIM_PAD = 128       # lane-dense padded style dim
IMG_RES = 16          # spatial resolution
IMG_CH = 3            # RGB
OUT_DIM = IMG_CH * IMG_RES * IMG_RES   # 768, multiple of 128 (lane-dense)
TRUNCATION_PSI = 0.7
LRELU_SLOPE = 0.2

MAX_TB = 2048         # batch tile; 2 bufs * 2048 rows * (3KB z+img) ~= 7 MB VMEM
                      # -> fits the 32 MiB scoped limit requested below on all gens


def _round_up(x, m):
    return ((x + m - 1) // m) * m


def _nerfgan_kernel(z_ref, w1_ref, b1_ref, w2_ref, b2_ref,
                    wsyn_ref, bsyn_ref, out_ref):
    """Fused mapping-network + (pre-folded) truncation + synthesis + tanh."""
    z = z_ref[...]
    # StyleGAN-style pixel-norm on the (unpadded, 32-lane) latent.
    z = z * jax.lax.rsqrt(jnp.mean(z * z, axis=-1, keepdims=True) + 1e-8)

    # Mapping MLP: bf16 operands into the MXU, f32 accumulate, f32 biases,
    # leaky-relu on the VPU.  Padded lanes of the weights are zero.
    h = jnp.dot(z.astype(jnp.bfloat16), w1_ref[...],
                preferred_element_type=jnp.float32) + b1_ref[...]
    h = jnp.maximum(h, LRELU_SLOPE * h)
    w = jnp.dot(h.astype(jnp.bfloat16), w2_ref[...],
                preferred_element_type=jnp.float32) + b2_ref[...]
    w = jnp.maximum(w, LRELU_SLOPE * w)

    # Truncation trick is folded into wsyn/bsyn at init time.
    # Synthesis: bf16 MXU matmul, f32 accumulate, tanh on EUP, bf16 store
    # (halves the dominant HBM writeback stream).
    img = jnp.dot(w.astype(jnp.bfloat16), wsyn_ref[...],
                  preferred_element_type=jnp.float32) + bsyn_ref[...]
    out_ref[...] = jnp.tanh(img).astype(out_ref.dtype)


def nerfgan_forward(parameter_z, params, z_initial=None):
    """Equivalent of nerfgan.forward(parameter_z): returns the raw generator
    image in NCHW (the PyTorch forward returns `out = img` un-post-processed
    in the projected_w is None branch).  Image dtype is bf16 (f32 accumulate
    in-kernel; tanh output in [-1,1] loses essentially nothing in bf16)."""
    # TODO(synk): real module loads G_ema/D from network_pkl and runs a NeRF
    # volume Renderer; `z_initial` / `noise_mode` / `render_option` have no
    # effect on this synthetic generator.
    del z_initial
    B = parameter_z.shape[0]

    # Pad the batch only to the 8-sublane granule (padded rows are masked off
    # by the wrapper slice below); ragged final tiles use Pallas partial-block
    # handling instead of padding all the way up to TB.
    B_pad = _round_up(B, 8)
    if B_pad != B:
        parameter_z = jnp.pad(parameter_z, ((0, B_pad - B), (0, 0)))

    # Batch tile: whenever there is more than one sublane granule of work,
    # ensure the grid has >=2 steps so both v7x TensorCores get a share of
    # the "parallel" batch axis (harmless on the 1-TC v5e/v6e chips).
    if B_pad <= 8:
        TB = B_pad
    else:
        TB = min(MAX_TB, _round_up((B_pad + 1) // 2, 8))
    grid = (pl.cdiv(B_pad, TB),)

    def const_full(shape):
        # Whole-array, grid-invariant block: stays resident in VMEM.
        return pl.BlockSpec(shape, lambda i, _n=len(shape): (0,) * _n)

    flat_img = pl.pallas_call(
        _nerfgan_kernel,
        out_shape=jax.ShapeDtypeStruct((B_pad, OUT_DIM), jnp.bfloat16),
        grid=grid,
        in_specs=[
            pl.BlockSpec((TB, Z_DIM), lambda i: (i, 0)),          # z  (tiled)
            const_full((Z_DIM, HIDDEN_PAD)),                      # w1 (bf16)
            const_full((1, HIDDEN_PAD)),                          # b1 (f32)
            const_full((HIDDEN_PAD, W_DIM_PAD)),                  # w2 (bf16)
            const_full((1, W_DIM_PAD)),                           # b2 (f32)
            const_full((W_DIM_PAD, OUT_DIM)),                     # w_syn (bf16)
            const_full((1, OUT_DIM)),                             # b_syn (f32)
        ],
        out_specs=pl.BlockSpec((TB, OUT_DIM), lambda i: (i, 0)),
        compiler_params=pltpu.CompilerParams(
            dimension_semantics=("parallel",),                    # megacore on v7x
            vmem_limit_bytes=32 << 20),                           # v5e headroom
    )(parameter_z,
      params["w1"], params["b1"], params["w2"], params["b2"],
      params["w_syn"], params["b_syn"])

    if B_pad != B:
        flat_img = flat_img[:B]
    # NCHW image, matching the PyTorch generator output convention.
    return flat_img.reshape(B, IMG_CH, IMG_RES, IMG_RES)


def init_params(key):
    """Deterministic synthetic weights (shapes implied by the generator),
    with the truncation trick folded into the synthesis affine, weight lane
    dims zero-padded to 128 for lane-dense vregs, and matmul operands stored
    bf16 (biases stay f32, added after f32 MXU accumulation)."""
    ks = jax.random.split(key, 4)

    # Logical-shape weights.
    w1 = jax.random.normal(ks[0], (Z_DIM, HIDDEN), jnp.float32) \
        / jnp.sqrt(jnp.float32(Z_DIM))
    b1 = jnp.zeros((1, HIDDEN), jnp.float32)
    w2 = jax.random.normal(ks[1], (HIDDEN, W_DIM), jnp.float32) \
        / jnp.sqrt(jnp.float32(HIDDEN))
    b2 = jnp.zeros((1, W_DIM), jnp.float32)
    w_avg = 0.01 * jax.random.normal(ks[2], (1, W_DIM), jnp.float32)
    w_syn = jax.random.normal(ks[3], (W_DIM, OUT_DIM), jnp.float32) \
        / jnp.sqrt(jnp.float32(W_DIM))
    b_syn = jnp.zeros((1, OUT_DIM), jnp.float32)

    # Fold the truncation trick  w' = w_avg + psi*(w - w_avg)  into the
    # synthesis affine:  img = psi*(w @ w_syn) + (1-psi)*(w_avg @ w_syn) + b_syn.
    w_syn_f = TRUNCATION_PSI * w_syn
    b_syn_f = b_syn + (1.0 - TRUNCATION_PSI) * (w_avg @ w_syn)

    # Zero-pad lane dims to 128 (padded rows/cols are zero, so padded lanes of
    # the intermediates are exactly zero and contribute nothing).  Matmul
    # weights are stored bf16 (single-pass MXU on all generations).
    w1_p = jnp.zeros((Z_DIM, HIDDEN_PAD), jnp.float32) \
        .at[:, :HIDDEN].set(w1).astype(jnp.bfloat16)
    b1_p = jnp.zeros((1, HIDDEN_PAD), jnp.float32).at[:, :HIDDEN].set(b1)
    w2_p = jnp.zeros((HIDDEN_PAD, W_DIM_PAD), jnp.float32) \
        .at[:HIDDEN, :W_DIM].set(w2).astype(jnp.bfloat16)
    b2_p = jnp.zeros((1, W_DIM_PAD), jnp.float32).at[:, :W_DIM].set(b2)
    w_syn_p = jnp.zeros((W_DIM_PAD, OUT_DIM), jnp.float32) \
        .at[:W_DIM, :].set(w_syn_f).astype(jnp.bfloat16)

    return {
        "w1": w1_p, "b1": b1_p,
        "w2": w2_p, "b2": b2_p,
        "w_syn": w_syn_p, "b_syn": b_syn_f,
    }


if __name__ == "__main__":
    key = jax.random.PRNGKey(0)
    k_param, k_z = jax.random.split(key)
    params = init_params(k_param)

    B = 2
    parameter_z = jax.random.normal(k_z, (B, Z_DIM), jnp.float32)

    # Structural pieces of the PyTorch forward (unconditional network):
    c_dim = 0
    label = jnp.zeros((1, c_dim), jnp.float32)              # label = zeros([1, c_dim])
    relative_range_u_scale = 2.0
    relative_range_u = [0.5 - 0.5 * relative_range_u_scale,
                        0.5 + 0.5 * relative_range_u_scale]
    del label, relative_range_u  # consumed by the (synthetic) generator

    out = nerfgan_forward(parameter_z, params)
    jax.block_until_ready(out)
    assert out.shape == (B, IMG_CH, IMG_RES, IMG_RES)
    assert out.dtype == jnp.bfloat16
    assert bool(jnp.all(jnp.isfinite(out.astype(jnp.float32))))
    print("KERNEL_OK")
</pallas_src>

<mosaic_0001>
module attributes {stable_mosaic.version = 11 : i64} {
  func.func @_nerfgan_kernel(%arg0: i32, %arg1: memref<8x32xf32, #tpu.memory_space<vmem>>, %arg2: memref<32x128xbf16, #tpu.memory_space<vmem>>, %arg3: memref<1x128xf32, #tpu.memory_space<vmem>>, %arg4: memref<128x128xbf16, #tpu.memory_space<vmem>>, %arg5: memref<1x128xf32, #tpu.memory_space<vmem>>, %arg6: memref<128x768xbf16, #tpu.memory_space<vmem>>, %arg7: memref<1x768xf32, #tpu.memory_space<vmem>>, %arg8: memref<8x768xbf16, #tpu.memory_space<vmem>>) attributes {dimension_semantics = [#tpu.dimension_semantics<parallel>], iteration_bounds = array<i64: 1>, scalar_prefetch = 0 : i64, scratch_operands = 0 : i64, tpu.core_type = #tpu.core_type<tc>, window_params = [{transform_indices = @transform_0, window_bounds = array<i64: 8, 32>}, {pipeline_mode = #tpu.pipeline_mode<synchronous>, transform_indices = @transform_1, window_bounds = array<i64: 32, 128>}, {pipeline_mode = #tpu.pipeline_mode<synchronous>, transform_indices = @transform_2, window_bounds = array<i64: 1, 128>}, {pipeline_mode = #tpu.pipeline_mode<synchronous>, transform_indices = @transform_3, window_bounds = array<i64: 128, 128>}, {pipeline_mode = #tpu.pipeline_mode<synchronous>, transform_indices = @transform_4, window_bounds = array<i64: 1, 128>}, {pipeline_mode = #tpu.pipeline_mode<synchronous>, transform_indices = @transform_5, window_bounds = array<i64: 128, 768>}, {pipeline_mode = #tpu.pipeline_mode<synchronous>, transform_indices = @transform_6, window_bounds = array<i64: 1, 768>}, {transform_indices = @transform_7, window_bounds = array<i64: 8, 768>}]} {
    %c0 = arith.constant 0 : index
    %c0_0 = arith.constant 0 : index
    %0 = vector.load %arg1[%c0, %c0_0] : memref<8x32xf32, #tpu.memory_space<vmem>>, vector<8x32xf32>
    %1 = arith.mulf %0, %0 : vector<8x32xf32>
    %cst = arith.constant dense<0.000000e+00> : vector<8xf32>
    %2 = vector.multi_reduction <add>, %1, %cst [1] : vector<8x32xf32> to vector<8xf32>
    %3 = vector.shape_cast %2 : vector<8xf32> to vector<8x1xf32>
    %cst_1 = arith.constant 3.200000e+01 : f32
    %4 = vector.broadcast %cst_1 : f32 to vector<8x1xf32>
    %5 = arith.divf %3, %4 : vector<8x1xf32>
    %cst_2 = arith.constant 9.99999993E-9 : f32
    %6 = vector.broadcast %cst_2 : f32 to vector<8x1xf32>
    %7 = arith.addf %5, %6 : vector<8x1xf32>
    %8 = math.rsqrt %7 : vector<8x1xf32>
    %9 = vector.broadcast %8 : vector<8x1xf32> to vector<8x32xf32>
    %10 = arith.mulf %0, %9 : vector<8x32xf32>
    %11 = arith.truncf %10 : vector<8x32xf32> to vector<8x32xbf16>
    %c0_3 = arith.constant 0 : index
    %c0_4 = arith.constant 0 : index
    %12 = vector.load %arg2[%c0_3, %c0_4] : memref<32x128xbf16, #tpu.memory_space<vmem>>, vector<32x128xbf16>
    %cst_5 = arith.constant dense<0.000000e+00> : vector<8x128xf32>
    %13 = tpu.matmul %11, %12, %cst_5 {dimension_numbers = #tpu.dot_dimension_numbers<[1], [0], [0], [1], [0, 0, 1, 1], [], []>} : vector<8x32xbf16>, vector<32x128xbf16>, vector<8x128xf32> -> vector<8x128xf32>
    %c0_6 = arith.constant 0 : index
    %c0_7 = arith.constant 0 : index
    %14 = vector.load %arg3[%c0_6, %c0_7] : memref<1x128xf32, #tpu.memory_space<vmem>>, vector<1x128xf32>
    %15 = vector.broadcast %14 : vector<1x128xf32> to vector<8x128xf32>
    %16 = arith.addf %13, %15 : vector<8x128xf32>
    %cst_8 = arith.constant 2.000000e-01 : f32
    %17 = vector.broadcast %cst_8 : f32 to vector<8x128xf32>
    %18 = arith.mulf %17, %16 : vector<8x128xf32>
    %19 = arith.maximumf %16, %18 : vector<8x128xf32>
    %20 = arith.truncf %19 : vector<8x128xf32> to vector<8x128xbf16>
    %c0_9 = arith.constant 0 : index
    %c0_10 = arith.constant 0 : index
    %21 = vector.load %arg4[%c0_9, %c0_10] : memref<128x128xbf16, #tpu.memory_space<vmem>>, vector<128x128xbf16>
    %cst_11 = arith.constant dense<0.000000e+00> : vector<8x128xf32>
    %22 = tpu.matmul %20, %21, %cst_11 {dimension_numbers = #tpu.dot_dimension_numbers<[1], [0], [0], [1], [0, 0, 1, 1], [], []>} : vector<8x128xbf16>, vector<128x128xbf16>, vector<8x128xf32> -> vector<8x128xf32>
    %c0_12 = arith.constant 0 : index
    %c0_13 = arith.constant 0 : index
    %23 = vector.load %arg5[%c0_12, %c0_13] : memref<1x128xf32, #tpu.memory_space<vmem>>, vector<1x128xf32>
    %24 = vector.broadcast %23 : vector<1x128xf32> to vector<8x128xf32>
    %25 = arith.addf %22, %24 : vector<8x128xf32>
    %cst_14 = arith.constant 2.000000e-01 : f32
    %26 = vector.broadcast %cst_14 : f32 to vector<8x128xf32>
    %27 = arith.mulf %26, %25 : vector<8x128xf32>
    %28 = arith.maximumf %25, %27 : vector<8x128xf32>
    %29 = arith.truncf %28 : vector<8x128xf32> to vector<8x128xbf16>
    %c0_15 = arith.constant 0 : index
    %c0_16 = arith.constant 0 : index
    %30 = vector.load %arg6[%c0_15, %c0_16] : memref<128x768xbf16, #tpu.memory_space<vmem>>, vector<128x768xbf16>
    %cst_17 = arith.constant dense<0.000000e+00> : vector<8x768xf32>
    %31 = tpu.matmul %29, %30, %cst_17 {dimension_numbers = #tpu.dot_dimension_numbers<[1], [0], [0], [1], [0, 0, 1, 1], [], []>} : vector<8x128xbf16>, vector<128x768xbf16>, vector<8x768xf32> -> vector<8x768xf32>
    %c0_18 = arith.constant 0 : index
    %c0_19 = arith.constant 0 : index
    %32 = vector.load %arg7[%c0_18, %c0_19] : memref<1x768xf32, #tpu.memory_space<vmem>>, vector<1x768xf32>
    %33 = vector.broadcast %32 : vector<1x768xf32> to vector<8x768xf32>
    %34 = arith.addf %31, %33 : vector<8x768xf32>
    %35 = math.tanh %34 : vector<8x768xf32>
    %36 = arith.truncf %35 : vector<8x768xf32> to vector<8x768xbf16>
    %c0_20 = arith.constant 0 : index
    %c0_21 = arith.constant 0 : index
    %37 = vector.load %arg8[%c0_20, %c0_21] : memref<8x768xbf16, #tpu.memory_space<vmem>>, vector<8x768xbf16>
    tpu.vector_store %arg8[%c0_20, %c0_21], %36 {strides = array<i32>} : memref<8x768xbf16, #tpu.memory_space<vmem>>, vector<8x768xbf16>,
    return
  }
  func.func @transform_0(%arg0: i32) -> (i32, i32) {
    %c0_i32 = arith.constant 0 : i32
    %c0_i32_0 = arith.constant 0 : i32
    return %arg0, %c0_i32 : i32, i32
  }
  func.func @transform_1(%arg0: i32) -> (i32, i32) {
    %c0_i32 = arith.constant 0 : i32
    %c0_i32_0 = arith.constant 0 : i32
    %c0_i32_1 = arith.constant 0 : i32
    return %c0_i32, %c0_i32_0 : i32, i32
  }
  func.func @transform_2(%arg0: i32) -> (i32, i32) {
    %c0_i32 = arith.constant 0 : i32
    %c0_i32_0 = arith.constant 0 : i32
    %c0_i32_1 = arith.constant 0 : i32
    return %c0_i32, %c0_i32_0 : i32, i32
  }
  func.func @transform_3(%arg0: i32) -> (i32, i32) {
    %c0_i32 = arith.constant 0 : i32
    %c0_i32_0 = arith.constant 0 : i32
    %c0_i32_1 = arith.constant 0 : i32
    return %c0_i32, %c0_i32_0 : i32, i32
  }
  func.func @transform_4(%arg0: i32) -> (i32, i32) {
    %c0_i32 = arith.constant 0 : i32
    %c0_i32_0 = arith.constant 0 : i32
    %c0_i32_1 = arith.constant 0 : i32
    return %c0_i32, %c0_i32_0 : i32, i32
  }
  func.func @transform_5(%arg0: i32) -> (i32, i32) {
    %c0_i32 = arith.constant 0 : i32
    %c0_i32_0 = arith.constant 0 : i32
    %c0_i32_1 = arith.constant 0 : i32
    return %c0_i32, %c0_i32_0 : i32, i32
  }
  func.func @transform_6(%arg0: i32) -> (i32, i32) {
    %c0_i32 = arith.constant 0 : i32
    %c0_i32_0 = arith.constant 0 : i32
    %c0_i32_1 = arith.constant 0 : i32
    return %c0_i32, %c0_i32_0 : i32, i32
  }
  func.func @transform_7(%arg0: i32) -> (i32, i32) {
    %c0_i32 = arith.constant 0 : i32
    %c0_i32_0 = arith.constant 0 : i32
    return %arg0, %c0_i32 : i32, i32
  }
}

</mosaic_0001>

<bundles_post_ra>
// kernel: tpu_custom_call.1
= control target key start
LH: loop header
LB: loop body
LE: loop exit
PB: predicated region body
PF: predicated region fallthrough
CT: control target
= control target key end

     0   :  { %12 = vsyncpa [#allocation3], 0  ;;  %s1231_s0 = inlined_call_operand.hbm [shape: f32[8,32], index: 0, kind: input, shape index: {}]   ;;  %s1232_s1 = inlined_call_operand.hbm [shape: bf16[32,128], index: 1, kind: input, shape index: {}]   ;;  %s1233_s2 = inlined_call_operand.vmem [shape: f32[1,128], index: 2, kind: input, shape index: {}]   ;;  %s1234_s3 = inlined_call_operand.hbm [shape: bf16[128,128], index: 3, kind: input, shape index: {}]   ;;  %s1235_s4 = inlined_call_operand.vmem [shape: f32[1,128], index: 4, kind: input, shape index: {}]   ;;  %s1236_s5 = inlined_call_operand.hbm [shape: bf16[128,768], index: 5, kind: input, shape index: {}]   ;;  %s1237_s6 = inlined_call_operand.vmem [shape: f32[1,768], index: 6, kind: input, shape index: {}]   ;;  %s1238_s7 = inlined_call_operand.hbm [shape: bf16[8,768], index: 7, kind: output, shape index: {}]  }
   0x1   :  { %13 = vsyncpa [#allocation6], 0 }
   0x2   :  { %14 = vsyncpa [#allocation9], 0 }
   0x3   :  { %15 = vsyncpa [#allocation4], 0  ;;  %s1102_s24 = smov [#allocation5]   ;;  %s984_s28 = scalar_lea.hbm %s1232_s1, 256 }
   0x4   :  { %s31_s25 = sshll.u32 %s1102_s24, 4  ;;  %p985_p0 = scmp.ne.s32.totalorder %s1232_s1, %s984_s28  ;;  %s32_s25 = int_to_ptr.vmem [resolvable:$true] %s31_s25 }
   0x5   :  { %p988_p1 = scmp.lt.u32.totalorder %s984_s28, %s1232_s1 }
   0x7   :  { %p990_p2 = pnand %p988_p1, %p985_p0 }
   0x9   :  { %993 = shalt.err (!%p990_p2)
}
   0xa   :  { %s994_s10 = scalar_lea.vmem %s32_s25, 256  ;;  %p999_p4 = scmp.lt.s32.totalorder %s32_s25, %s32_s25 }
   0xb   :  { %p995_p3 = scmp.ne.s32.totalorder %s32_s25, %s994_s10  ;;  %p1000_p5 = scmp.lt.s32.totalorder %s994_s10, %s994_s10 }
   0xd   :  { %p1001_p6 = por %p1000_p5, %p999_p4 }
   0xf   :  { %p1002_p7 = pnand %p1001_p6, %p995_p3 }
  0x11   :  { %1005 = shalt.err (!%p1002_p7)
}
  0x12   :  { %s1103_s11 = smov 64   ;;  %s1104_s12 = smov 4  }
  0x13   :  { %37 = dma.hbm_to_vmem [thread:$0]  %s1232_s1, 256, %s32_s25, [#allocation6], %s1103_s11, %s1103_s11, %s1104_s12  }
  0x14   :  { %s1105_s15 = smov [#allocation2]   ;;  %s1106_s17 = smov [#allocation7]  }
  0x15   :  { %s22_s16 = sshll.u32 %s1105_s15, 4  ;;  %s45_s18 = sshll.u32 %s1106_s17, 4  ;;  %s23_s16 = int_to_ptr.vmem [resolvable:$true] %s22_s16  ;;  %s46_s18 = int_to_ptr.vmem [resolvable:$true] %s45_s18 }
  0x16   :  { %s1006_s21 = scalar_lea.hbm %s1231_s0, 128 }
  0x17   :  { %p1007_p8 = scmp.ne.s32.totalorder %s1231_s0, %s1006_s21  ;;  %p1010_p9 = scmp.lt.u32.totalorder %s1006_s21, %s1231_s0 }
  0x19   :  { %p1012_p10 = pnand %p1010_p9, %p1007_p8 }
  0x1b   :  { %1015 = shalt.err (!%p1012_p10)
}
  0x1c   :  { %s1016_s1 = scalar_lea.vmem %s23_s16, 128  ;;  %p1021_p12 = scmp.lt.s32.totalorder %s23_s16, %s23_s16 }
  0x1d   :  { %p1017_p11 = scmp.ne.s32.totalorder %s23_s16, %s1016_s1  ;;  %p1022_p13 = scmp.lt.s32.totalorder %s1016_s1, %s1016_s1 }
  0x1f   :  { %p1023_p0 = por %p1022_p13, %p1021_p12 }
  0x21   :  { %p1024_p1 = pnand %p1023_p0, %p1017_p11 }
  0x23   :  { %1027 = shalt.err (!%p1024_p1)
}
  0x24   :  { %25 = dma.hbm_to_vmem [thread:$0]  %s1231_s0, 128, %s23_s16, [#allocation3]  }
  0x25   :  { %s1028_s30 = scalar_lea.hbm %s1234_s3, 1024 }
  0x26   :  { %p1029_p2 = scmp.ne.s32.totalorder %s1234_s3, %s1028_s30  ;;  %p1032_p3 = scmp.lt.u32.totalorder %s1028_s30, %s1234_s3 }
  0x28   :  { %p1034_p4 = pnand %p1032_p3, %p1029_p2 }
  0x2a   :  { %1037 = shalt.err (!%p1034_p4)
}
  0x2b   :  { %s1038_s14 = scalar_lea.vmem %s46_s18, 1024  ;;  %p1043_p6 = scmp.lt.s32.totalorder %s46_s18, %s46_s18 }
  0x2c   :  { %p1039_p5 = scmp.ne.s32.totalorder %s46_s18, %s1038_s14  ;;  %p1044_p7 = scmp.lt.s32.totalorder %s1038_s14, %s1038_s14 }
  0x2e   :  { %p1045_p8 = por %p1044_p7, %p1043_p6 }
  0x30   :  { %p1046_p9 = pnand %p1045_p8, %p1039_p5 }
  0x32   :  { %1049 = shalt.err (!%p1046_p9)
}
  0x33   :  { %51 = dma.hbm_to_vmem [thread:$0]  %s1234_s3, 1024, %s46_s18, [#allocation6], %s1103_s11, %s1103_s11, %s1104_s12  }
  0x34   :  { %s1107_s16 = smov [#allocation8]   ;;  %s1050_s21 = scalar_lea.hbm %s1236_s5, 6144 }
  0x35   :  { %s59_s17 = sshll.u32 %s1107_s16, 4  ;;  %p1051_p10 = scmp.ne.s32.totalorder %s1236_s5, %s1050_s21  ;;  %s60_s17 = int_to_ptr.vmem [resolvable:$true] %s59_s17 }
  0x36   :  { %p1054_p11 = scmp.lt.u32.totalorder %s1050_s21, %s1236_s5 }
  0x38   :  { %p1056_p12 = pnand %p1054_p11, %p1051_p10 }
  0x3a   :  { %1059 = shalt.err (!%p1056_p12)
}
  0x3b   :  { %s1060_s1 = scalar_lea.vmem %s60_s17, 6144  ;;  %p1065_p0 = scmp.lt.s32.totalorder %s60_s17, %s60_s17 }
  0x3c   :  { %p1061_p13 = scmp.ne.s32.totalorder %s60_s17, %s1060_s1  ;;  %p1066_p1 = scmp.lt.s32.totalorder %s1060_s1, %s1060_s1 }
  0x3e   :  { %p1067_p2 = por %p1066_p1, %p1065_p0 }
  0x40   :  { %p1068_p3 = pnand %p1067_p2, %p1061_p13 }
  0x42   :  { %1071 = shalt.err (!%p1068_p3)
}
  0x43   :  { %s1108_s3 = smov 384   ;;  %s1109_s11 = smov 24  }
  0x44   :  { %65 = dma.hbm_to_vmem [thread:$0]  %s1236_s5, 6144, %s60_s17, [#allocation9], %s1108_s3, %s1108_s3, %s1109_s11  }
  0x45   :  { %1094 = dma.done.wait [#allocation3], 128  }
  0x46   :  { %1095 = vsyncadd [#allocation3], 4294967168 }
  0x47   :  { %1096 = dma.done.wait [#allocation6], 1280  }
  0x48   :  { %1097 = vsyncadd [#allocation6], 4294966016 }
  0x49   :  { %1098 = dma.done.wait [#allocation9], 6144  }
  0x4a   :  { %1099 = vsyncadd [#allocation9], 4294961152  ;;  %v81_v0 = vld [vmem:[#allocation2] sm:$0xff]  ;;  %vm83_vm0 = vcmask 261120   ;;  %v888_v3 = vld [vmem:[#allocation5] sm:$0xff]   ;;  %v1110_v4 = vmov 0.0  }
  0x4b   :  { %v82_v1 = vmul.f32 %v81_v0, %v81_v0  ;;  %848 = vmatprep.subr.bf16.mxu0 %v1110_v4  ;;  %vm1111_vm1 = vmmov 0   ;;  %v889_v5 = vld [vmem:[#allocation5 + $0x8] sm:$0xff]   ;;  %856 = vmatprep.subr.bf16.mxu1 %v1110_v4  ;;  %v890_v6 = vld [vmem:[#allocation7] sm:$0xff]   ;;  %v891_v7 = vld [vmem:[#allocation7 + $0x8] sm:$0xff]   ;;  %v1112_v62 = vmov 0  }
  0x4c   :  { %852 = vmatprep.mubr.msk.bf16.mxu0 %vm1111_vm1, %v1110_v4  ;;  %849 = vmatpush3.bf16.msra.mxu0 %v888_v3  ;;  %v892_v8 = vld [vmem:[#allocation7 + $0x10] sm:$0xff]   ;;  %v893_v9 = vld [vmem:[#allocation7 + $0x18] sm:$0xff]   ;;  %v894_v10 = vld [vmem:[#allocation7 + $0x20] sm:$0xff]  }
  0x4d   :  { %v84_v2 = vsel %vm83_vm0, %v82_v1, 0.0  ;;  %850 = vmatprep.subr.bf16.mxu0 %v1110_v4  ;;  %872 = vmatprep.mubr.msk.bf16.mxu1 %vm1111_vm1, %v1110_v4  ;;  %v895_v11 = vld [vmem:[#allocation7 + $0x28] sm:$0xff]   ;;  %v896_v18 = vld [vmem:[#allocation7 + $0x30] sm:$0xff]   ;;  %v897_v19 = vld [vmem:[#allocation7 + $0x38] sm:$0xff]  }
  0x4e   :  { %85 = vadd.xlane.f32.xlu0 %v84_v2  ;;  %857 = vmatpush3.bf16.msra.mxu1 %v890_v6  ;;  %v898_v20 = vld [vmem:[#allocation8] ss:$24 sps:$4 sm:$0xff]   ;;  %v900_v21 = vld [vmem:[#allocation8 + $0x4] ss:$24 sps:$4 sm:$0xff]   ;;  %v906_v23 = vld [vmem:[#allocation8 + $0x34] ss:$24 sps:$4 sm:$0xff]  }
  0x4f   :  { %858 = vmatprep.subr.bf16.mxu1 %v1110_v4  ;;  %v903_v22 = vld [vmem:[#allocation8 + $0xc] ss:$24 sps:$4 sm:$0xff]   ;;  %v904_v24 = vld [vmem:[#allocation8 + $0x30] ss:$24 sps:$4 sm:$0xff]   ;;  %v910_v26 = vld [vmem:[#allocation8 + $0x60] ss:$24 sps:$4 sm:$0xff]  }
  0x50   :  { %851 = vmatpush3.bf16.msra.mxu0 %v889_v5  ;;  %v912_v25 = vld [vmem:[#allocation8 + $0x64] ss:$24 sps:$4 sm:$0xff]   ;;  %v918_v27 = vld [vmem:[#allocation8 + $0x94] ss:$24 sps:$4 sm:$0xff]   ;;  %v916_v28 = vld [vmem:[#allocation8 + $0x90] ss:$24 sps:$4 sm:$0xff]  }
  0x51   :  { %596 = vmatprep.subr.bf16.mxu0 %v900_v21  ;;  %v924_v29 = vld [vmem:[#allocation8 + $0xc4] ss:$24 sps:$4 sm:$0xff]   ;;  %v922_v30 = vld [vmem:[#allocation8 + $0xc0] ss:$24 sps:$4 sm:$0xff]   ;;  %v930_v31 = vld [vmem:[#allocation8 + $0xf4] ss:$24 sps:$4 sm:$0xff]  }
  0x52   :  { %859 = vmatpush3.bf16.msra.mxu1 %v891_v7  ;;  %v928_v32 = vld [vmem:[#allocation8 + $0xf0] ss:$24 sps:$4 sm:$0xff]   ;;  %v909_v43 = vld [vmem:[#allocation8 + $0x3c] ss:$24 sps:$4 sm:$0xff]   ;;  %v915_v45 = vld [vmem:[#allocation8 + $0x6c] ss:$24 sps:$4 sm:$0xff]  }
  0x53   :  { %860 = vmatprep.subr.bf16.mxu1 %v1110_v4  ;;  %v769_v33 = vld [vmem:[%s1233_s2] ss:$0 sm:$0xff]  ;;  %v907_v44 = vld [vmem:[#allocation8 + $0x38] ss:$24 sps:$4 sm:$0xff]   ;;  %v921_v47 = vld [vmem:[#allocation8 + $0x9c] ss:$24 sps:$4 sm:$0xff]  }
  0x54   :  { %v901_v41 = vld [vmem:[#allocation8 + $0x8] ss:$24 sps:$4 sm:$0xff]   ;;  %v919_v48 = vld [vmem:[#allocation8 + $0x98] ss:$24 sps:$4 sm:$0xff]   ;;  %v927_v49 = vld [vmem:[#allocation8 + $0xcc] ss:$24 sps:$4 sm:$0xff]  }
  0x55   :  { %v913_v46 = vld [vmem:[#allocation8 + $0x68] ss:$24 sps:$4 sm:$0xff]   ;;  %v933_v51 = vld [vmem:[#allocation8 + $0xfc] ss:$24 sps:$4 sm:$0xff]   ;;  %v931_v52 = vld [vmem:[#allocation8 + $0xf8] ss:$24 sps:$4 sm:$0xff]  }
  0x56   :  { %861 = vmatpush3.bf16.msra.mxu1 %v892_v8  ;;  %v925_v50 = vld [vmem:[#allocation8 + $0xc8] ss:$24 sps:$4 sm:$0xff]   ;;  %v936_v53 = vld [vmem:[#allocation8 + $0x124] ss:$24 sps:$4 sm:$0xff]   ;;  %v942_v57 = vld [vmem:[#allocation8 + $0x154] ss:$24 sps:$4 sm:$0xff]  }
  0x57   :  { %862 = vmatprep.subr.bf16.mxu1 %v1110_v4  ;;  %v934_v54 = vld [vmem:[#allocation8 + $0x120] ss:$24 sps:$4 sm:$0xff]   ;;  %v939_v55 = vld [vmem:[#allocation8 + $0x12c] ss:$24 sps:$4 sm:$0xff]   ;;  %v940_v58 = vld [vmem:[#allocation8 + $0x150] ss:$24 sps:$4 sm:$0xff]  }
  0x58   :  { %v937_v56 = vld [vmem:[#allocation8 + $0x128] ss:$24 sps:$4 sm:$0xff]   ;;  %v945_v59 = vld [vmem:[#allocation8 + $0x15c] ss:$24 sps:$4 sm:$0xff]   ;;  %v943_v60 = vld [vmem:[#allocation8 + $0x158] ss:$24 sps:$4 sm:$0xff]  }
  0x59   :  { %v948_v61 = vld [vmem:[#allocation8 + $0x14] ss:$24 sps:$4 sm:$0xff]   ;;  %v773_v63 = vld [vmem:[%s1235_s4] ss:$0 sm:$0xff]  ;;  %v969_v21 = vld [vmem:[#allocation8 + $0x164] ss:$24 sps:$4 sm:$0xff]  }
  0x5a   :  { %863 = vmatpush3.bf16.msra.mxu1 %v893_v9  ;;  %v946_v7 = vld [vmem:[#allocation8 + $0x10] ss:$24 sps:$4 sm:$0xff]   ;;  %v951_v9 = vld [vmem:[#allocation8 + $0x44] ss:$24 sps:$4 sm:$0xff]  }
  0x5b   :  { %864 = vmatprep.subr.bf16.mxu1 %v1110_v4 }
  0x5e   :  { %865 = vmatpush3.bf16.msra.mxu1 %v894_v10  ;;  %v949_v10 = vld [vmem:[#allocation8 + $0x40] ss:$24 sps:$4 sm:$0xff]  }
  0x5f   :  { %866 = vmatprep.subr.bf16.mxu1 %v1110_v4 }
  0x62   :  { %867 = vmatpush3.bf16.msra.mxu1 %v895_v11  ;;  %v954_v11 = vld [vmem:[#allocation8 + $0x74] ss:$24 sps:$4 sm:$0xff]  }
  0x63   :  { %868 = vmatprep.subr.bf16.mxu1 %v1110_v4 }
  0x66   :  { %869 = vmatpush3.bf16.msra.mxu1 %v896_v18  ;;  %v961_v18 = vld [vmem:[#allocation8 + $0x100] ss:$24 sps:$4 sm:$0xff]  }
  0x67   :  { %870 = vmatprep.subr.bf16.mxu1 %v1110_v4 }
  0x6a   :  { %871 = vmatpush3.bf16.msra.mxu1 %v897_v19  ;;  %v966_v19 = vld [vmem:[#allocation8 + $0x134] ss:$24 sps:$4 sm:$0xff]  }
  0x6b   :  { %637 = vmatprep.subr.bf16.mxu1 %v903_v22  ;;  %v967_v22 = vld [vmem:[#allocation8 + $0x160] ss:$24 sps:$4 sm:$0xff]  }
  0xdb   :  { %v86_v12 = vpop.xlane.xlu0 %85 }
  0xdc   :  { %v88_v13 = vmul.f32 0.03125, %v86_v12  ;;  %v952_v12 = vld [vmem:[#allocation8 + $0x70] ss:$24 sps:$4 sm:$0xff]  }
  0xde   :  { %v89_v14 = vadd.f32 1e-08, %v88_v13  ;;  %v957_v13 = vld [vmem:[#allocation8 + $0xa4] ss:$24 sps:$4 sm:$0xff]  }
  0xe0   :  { %970 = vrsqrt.f32 %v89_v14  ;;  %v955_v14 = vld [vmem:[#allocation8 + $0xa0] ss:$24 sps:$4 sm:$0xff]  }
  0xea   :  { %v971_v15 = vpop.eup %970 }
  0xeb   :  { %v91_v16 = vmul.f32 %v971_v15, %v81_v0  ;;  %v960_v15 = vld [vmem:[#allocation8 + $0xd4] ss:$24 sps:$4 sm:$0xff]  }
  0xed   :  { %v92_v17 = vpack.c.bf16 %v91_v16, %v91_v16  ;;  %v958_v16 = vld [vmem:[#allocation8 + $0xd0] ss:$24 sps:$4 sm:$0xff]  }
  0xef   :  { %853 = vmatmul.mubr.msk.bf16.vlgmr.msra.gmra.mrb[0].mxu0 %vm83_vm0, %v92_v17  ;;  %v963_v17 = vld [vmem:[#allocation8 + $0x104] ss:$24 sps:$4 sm:$0xff]  }
  0xf0   :  { %597 = vmatpush1.bf16.msra.mxu0 %v898_v20  ;;  %628 = vmatprep.mubr.bf16.mxu0 %v1112_v62  ;;  %v964_v20 = vld [vmem:[#allocation8 + $0x130] ss:$24 sps:$4 sm:$0xff]  }
  0xf1   :  { %598 = vmatprep.subr.bf16.mxu0 %v906_v23  ;;  %v326_v23 = vlaneseq }
  0xf4   :  { %599 = vmatpush1.bf16.msra.mxu0 %v904_v24  ;;  %v327_v24 = vshrl.u32 %v326_v23, 7 }
  0xf5   :  { %600 = vmatprep.subr.bf16.mxu0 %v912_v25 }
  0xf6   :  { %v328_v25 = vsub.s32 0, %v327_v24 }
  0xf8   :  { %601 = vmatpush1.bf16.msra.mxu0 %v910_v26  ;;  %v336_v26 = vsub.s32 2, %v327_v24 }
  0xf9   :  { %602 = vmatprep.subr.bf16.mxu0 %v918_v27  ;;  %v324_v27 = vld [vmem:[%s1237_s6] sm:$0x3f]  ;;  %s1113_s6 = smov [#allocation10]  }
  0xfa   :  { %s758_s29 = sshll.u32 %s1113_s6, 4  ;;  %s759_s29 = int_to_ptr.vmem [resolvable:$true] %s758_s29 }
  0xfb   :  { %s1072_s30 = scalar_lea.vmem %s759_s29, 384  ;;  %p1077_p5 = scmp.lt.s32.totalorder %s759_s29, %s759_s29 }
  0xfc   :  { %603 = vmatpush1.bf16.msra.mxu0 %v916_v28  ;;  %v332_v28 = vsub.s32 1, %v327_v24  ;;  %p1073_p4 = scmp.ne.s32.totalorder %s759_s29, %s1072_s30  ;;  %p1078_p6 = scmp.lt.s32.totalorder %s1072_s30, %s1072_s30 }
  0xfd   :  { %604 = vmatprep.subr.bf16.mxu0 %v924_v29  ;;  %v340_v29 = vsub.s32 3, %v327_v24 }
  0xfe   :  { %p1079_p7 = por %p1078_p6, %p1077_p5 }
 0x100   :  { %605 = vmatpush1.bf16.msra.mxu0 %v922_v30  ;;  %v329_v30 = vrot.slane %v324_v27, %v328_v25  ;;  %p1080_p8 = pnand %p1079_p7, %p1073_p4 }
 0x101   :  { %606 = vmatprep.subr.bf16.mxu0 %v930_v31  ;;  %v337_v31 = vrot.slane %v324_v27, %v336_v26 }
 0x104   :  { %607 = vmatpush1.bf16.msra.mxu0 %v928_v32  ;;  %v333_v32 = vrot.slane %v324_v27, %v332_v28 }
 0x105   :  { %608 = vmatprep.subr.bf16.mxu0 %v936_v53  ;;  %v348_v53 = vsub.s32 5, %v327_v24 }
 0x108   :  { %609 = vmatpush1.bf16.msra.mxu0 %v934_v54 }
 0x109   :  { %610 = vmatprep.subr.bf16.mxu0 %v942_v57 }
 0x10c   :  { %611 = vmatpush1.bf16.msra.mxu0 %v940_v58 }
 0x10d   :  { %678 = vmatprep.subr.bf16.mxu0 %v948_v61 }
 0x1c2   :  { %v153_v34 = vpop.f32.mrb[0].mxu0 }
 0x1c3   :  { %v154_v35 = vadd.f32 %v769_v33, %v153_v34  ;;  %v854_v36 = vpop.f32.mrb[1].mxu0  ;;  %v341_v33 = vrot.slane %v324_v27, %v340_v29 }
 0x1c4   :  { %v156_v37 = vpop.f32.mrb[2].mxu0 }
 0x1c5   :  { %v159_v38 = vmul.f32 0.2, %v154_v35  ;;  %v855_v39 = vpop.f32.mrb[3].mxu0 }
 0x1c7   :  { %v160_v40 = vmax.f32 %v154_v35, %v159_v38 }
 0x1c9   :  { %v161_v42 = vpack.c.bf16 %v160_v40, %v160_v40 }
 0x1cb   :  { %873 = vmatmul.mubr.bf16.vlgmr.msra.gmra.mrb[0].mxu1 %v161_v42 }
 0x1cc   :  { %638 = vmatpush1.bf16.msra.mxu1 %v901_v41  ;;  %669 = vmatprep.mubr.bf16.mxu1 %v1112_v62 }
 0x1cd   :  { %639 = vmatprep.subr.bf16.mxu1 %v909_v43 }
 0x1d0   :  { %640 = vmatpush1.bf16.msra.mxu1 %v907_v44 }
 0x1d1   :  { %641 = vmatprep.subr.bf16.mxu1 %v915_v45 }
 0x1d4   :  { %642 = vmatpush1.bf16.msra.mxu1 %v913_v46 }
 0x1d5   :  { %643 = vmatprep.subr.bf16.mxu1 %v921_v47 }
 0x1d8   :  { %644 = vmatpush1.bf16.msra.mxu1 %v919_v48 }
 0x1d9   :  { %645 = vmatprep.subr.bf16.mxu1 %v927_v49 }
 0x1dc   :  { %646 = vmatpush1.bf16.msra.mxu1 %v925_v50 }
 0x1dd   :  { %647 = vmatprep.subr.bf16.mxu1 %v933_v51 }
 0x1e0   :  { %648 = vmatpush1.bf16.msra.mxu1 %v931_v52  ;;  %v344_v52 = vsub.s32 4, %v327_v24 }
 0x1e1   :  { %649 = vmatprep.subr.bf16.mxu1 %v939_v55  ;;  %v349_v55 = vrot.slane %v324_v27, %v348_v53 }
 0x1e2   :  { %v345_v54 = vrot.slane %v324_v27, %v344_v52 }
 0x1e4   :  { %650 = vmatpush1.bf16.msra.mxu1 %v937_v56 }
 0x1e5   :  { %651 = vmatprep.subr.bf16.mxu1 %v945_v59 }
 0x1e8   :  { %652 = vmatpush1.bf16.msra.mxu1 %v943_v60 }
 0x29e   :  { %v267_v0 = vpop.f32.mrb[0].mxu1 }
 0x29f   :  { %v268_v1 = vadd.f32 %v773_v63, %v267_v0  ;;  %v874_v2 = vpop.f32.mrb[1].mxu1 }
 0x2a0   :  { %v270_v3 = vpop.f32.mrb[2].mxu1 }
 0x2a1   :  { %v273_v4 = vmul.f32 0.2, %v268_v1  ;;  %v875_v5 = vpop.f32.mrb[3].mxu1 }
 0x2a3   :  { %v274_v6 = vmax.f32 %v268_v1, %v273_v4 }
 0x2a5   :  { %v275_v8 = vpack.c.bf16 %v274_v6, %v274_v6 }
 0x2a7   :  { %629 = vmatmul.mubr.bf16.vlgmr.msra.gmra.mrb[4].mxu0 %v275_v8  ;;  %670 = vmatmul.mubr.bf16.vlgmr.msra.gmra.mrb[4].mxu1 %v275_v8 }
 0x2a8   :  { %679 = vmatpush1.bf16.msra.mxu0 %v946_v7  ;;  %710 = vmatprep.mubr.bf16.mxu0 %v1112_v62 }
 0x2a9   :  { %680 = vmatprep.subr.bf16.mxu0 %v951_v9 }
 0x2ac   :  { %681 = vmatpush1.bf16.msra.mxu0 %v949_v10 }
 0x2ad   :  { %682 = vmatprep.subr.bf16.mxu0 %v954_v11 }
 0x2b0   :  { %683 = vmatpush1.bf16.msra.mxu0 %v952_v12 }
 0x2b1   :  { %684 = vmatprep.subr.bf16.mxu0 %v957_v13 }
 0x2b4   :  { %685 = vmatpush1.bf16.msra.mxu0 %v955_v14 }
 0x2b5   :  { %686 = vmatprep.subr.bf16.mxu0 %v960_v15 }
 0x2b8   :  { %687 = vmatpush1.bf16.msra.mxu0 %v958_v16 }
 0x2b9   :  { %688 = vmatprep.subr.bf16.mxu0 %v963_v17 }
 0x2bc   :  { %689 = vmatpush1.bf16.msra.mxu0 %v961_v18 }
 0x2bd   :  { %690 = vmatprep.subr.bf16.mxu0 %v966_v19 }
 0x2c0   :  { %691 = vmatpush1.bf16.msra.mxu0 %v964_v20 }
 0x2c1   :  { %692 = vmatprep.subr.bf16.mxu0 %v969_v21 }
 0x2c4   :  { %693 = vmatpush1.bf16.msra.mxu0 %v967_v22 }
 0x2c7   :  { %711 = vmatmul.mubr.bf16.vlgmr.msra.gmra.mrb[8].mxu0 %v275_v8 }
 0x37a   :  { %v630_v34 = vpop.f32.mrb[4].mxu0  ;;  %v671_v35 = vpop.f32.mrb[4].mxu1 }
 0x37b   :  { %v631_v36 = vadd.f32 %v630_v34, %v329_v30  ;;  %v672_v37 = vadd.f32 %v671_v35, %v337_v31  ;;  %v632_v38 = vpop.f32.mrb[5].mxu0  ;;  %v673_v39 = vpop.f32.mrb[5].mxu1 }
 0x37c   :  { %v633_v40 = vadd.f32 %v632_v38, %v333_v32  ;;  %v674_v41 = vadd.f32 %v673_v39, %v341_v33  ;;  %v634_v42 = vpop.f32.mrb[6].mxu0  ;;  %v675_v43 = vpop.f32.mrb[6].mxu1 }
 0x37d   :  { %972 = vtanh.f32 %v631_v36  ;;  %v635_v44 = vpop.f32.mrb[7].mxu0  ;;  %v676_v45 = vpop.f32.mrb[7].mxu1 }
 0x37e   :  { %974 = vtanh.f32 %v672_v37 }
 0x37f   :  { %976 = vtanh.f32 %v633_v40 }
 0x380   :  { %978 = vtanh.f32 %v674_v41 }
 0x387   :  { %v973_v46 = vpop.eup %972 }
 0x388   :  { %v975_v47 = vpop.eup %974 }
 0x389   :  { %v977_v48 = vpop.eup %976 }
 0x38a   :  { %v979_v49 = vpop.eup %978  ;;  %v833_v50 = vpack.c.bf16 %v977_v48, %v973_v46 }
 0x38b   :  { %v834_v51 = vpack.c.bf16 %v979_v49, %v975_v47 }
 0x38c   :  { %749 = vst [vmem:[#allocation10] sm:$0xff] %v833_v50 }
 0x38d   :  { %750 = vst [vmem:[#allocation10 + $0x8] sm:$0xff] %v834_v51 }
 0x39a   :  { %v712_v56 = vpop.f32.mrb[8].mxu0 }
 0x39b   :  { %v713_v57 = vadd.f32 %v712_v56, %v345_v54  ;;  %v714_v58 = vpop.f32.mrb[9].mxu0 }
 0x39c   :  { %v715_v59 = vadd.f32 %v714_v58, %v349_v55  ;;  %v716_v60 = vpop.f32.mrb[10].mxu0 }
 0x39d   :  { %980 = vtanh.f32 %v713_v57  ;;  %v717_v61 = vpop.f32.mrb[11].mxu0 }
 0x39e   :  { %982 = vtanh.f32 %v715_v59 }
 0x3a7   :  { %v981_v62 = vpop.eup %980 }
 0x3a8   :  { %v983_v63 = vpop.eup %982 }
 0x3a9   :  { %v835_v0 = vpack.c.bf16 %v983_v63, %v981_v62 }
 0x3ab   :  { %751 = vst [vmem:[#allocation10 + $0x10] sm:$0xff] %v835_v0 }
 0x3ac   :  { %1083 = shalt.err (!%p1080_p8)
}
 0x3ad   :  { %s1084_s10 = scalar_lea.hbm %s1238_s7, 384 }
 0x3ae   :  { %p1085_p9 = scmp.ne.s32.totalorder %s1238_s7, %s1084_s10  ;;  %p1088_p10 = scmp.lt.u32.totalorder %s1084_s10, %s1238_s7 }
 0x3b0   :  { %p1090_p11 = pnand %p1088_p10, %p1085_p9 }
 0x3b2   :  { %1093 = shalt.err (!%p1090_p11)
}
 0x3b3   :  { %761 = dma.vmem_to_hbm [thread:$0]  %s759_s29, 384, %s1238_s7, [#allocation4]  }
 0x3b4   :  { %1100 = dma.done.wait [#allocation4], 384  }
 0x3b5   :  { %1101 = vsyncadd [#allocation4], 4294966912 }
 0x3b6   :  { %765 = vsyncpa [#allocation3], 1 }
 0x3b7   :  { %766 = vsyncpa [#allocation6], 1 }
 0x3b8   :  { %767 = vsyncpa [#allocation9], 1 }
 0x3b9   :  { %768 = vsyncpa [#allocation4], 1 }

</bundles_post_ra>
